<compile_context>
chip_gen: v6e
topology: v6e:2x2x1
jax: 0.10.0
libtpu: 0.0.40
codegen_flags: <defaults>
</compile_context>

<pallas_src>
import functools
import math

import jax
import jax.numpy as jnp
from jax.experimental import pallas as pl
from jax.experimental.pallas import tpu as pltpu


def _round_up(x, m):
    return (x + m - 1) // m * m


def _erf_f32(x):
    # Abramowitz & Stegun 7.1.26 rational approximation (|err| <= 1.5e-7), built from
    # VPU/EUP-friendly ops only (mul/add/div/exp/select) so it always lowers in Mosaic.
    a1, a2, a3, a4, a5 = 0.254829592, -0.284496736, 1.421413741, -1.453152027, 1.061405429
    p = 0.3275911
    s = jnp.where(x < 0.0, -1.0, 1.0)
    ax = jnp.abs(x)
    t = 1.0 / (1.0 + p * ax)
    poly = ((((a5 * t + a4) * t + a3) * t + a2) * t + a1) * t
    return s * (1.0 - poly * jnp.exp(-ax * ax))


def _gelu_exact(x):
    # torch.nn.GELU default: 0.5 * x * (1 + erf(x / sqrt(2)))
    return 0.5 * x * (1.0 + _erf_f32(x * (1.0 / math.sqrt(2.0))))


def _ffn_kernel(x_ref, w1_ref, b1_ref, w2_ref, b2_ref, *rest, add_residual):
    if add_residual:
        res_ref, o_ref = rest
    else:
        (o_ref,) = rest
    # FC1 on the MXU, f32 accumulation.
    h = jnp.dot(x_ref[...], w1_ref[...], preferred_element_type=jnp.float32)
    h = h + b1_ref[...].astype(jnp.float32)
    h = _gelu_exact(h)
    # FC2 on the MXU, f32 accumulation.
    out = jnp.dot(h.astype(w2_ref.dtype), w2_ref[...],
                  preferred_element_type=jnp.float32)
    out = out + b2_ref[...].astype(jnp.float32)
    if add_residual:
        out = out + res_ref[...].astype(jnp.float32)
    o_ref[...] = out.astype(o_ref.dtype)


def _choose_tm(m_rows, d_pad, f_pad, stream_itemsize):
    """Pick an M tile: multiple of 8, sized against a 48 MiB VMEM budget (fits v7x)."""
    budget = 48 * 1024 * 1024
    # Resident (double-buffered) weights + biases.
    weight_bytes = 2 * (2 * d_pad * f_pad * stream_itemsize + (f_pad + d_pad) * 4)
    # Per-row: double-buffered x / residual / output streams + f32 temporaries (h, out).
    per_row = 2 * 3 * d_pad * stream_itemsize + (f_pad + d_pad) * 4
    avail = max(budget - weight_bytes, 8 * per_row)
    tm = int(avail // per_row)
    tm = min(tm, 2048)
    tm = max(8, tm - tm % 8)
    return min(tm, _round_up(m_rows, 8))


def _pad_cast_2d(a, rows, cols, dtype):
    """Zero-pad a 2-D array to (rows, cols) and cast; no-op copy avoided when aligned."""
    if a.shape == (rows, cols) and a.dtype == jnp.dtype(dtype):
        return a
    out = jnp.zeros((rows, cols), dtype)
    return out.at[: a.shape[0], : a.shape[1]].set(a.astype(dtype))


def ffn_forward(x, params, residual=None, *, add_residual=True,
                compute_dtype=None, tm=None, interpret=False):
    """FFN forward.  x: (..., embed_dims).  params use torch.nn.Linear layout:
    w1 (F, D), b1 (F,), w2 (D, F), b2 (D,)."""
    w1, b1, w2, b2 = params["w1"], params["b1"], params["w2"], params["b2"]
    D = x.shape[-1]
    F = w1.shape[0]
    assert w1.shape == (F, D) and b1.shape == (F,)
    assert w2.shape == (D, F) and b2.shape == (D,)

    out_dtype = x.dtype
    cdt = out_dtype if compute_dtype is None else compute_dtype

    x2 = x.reshape(-1, D)
    M = x2.shape[0]

    # Lane-dense / MXU-friendly padding of the feature dims.
    d_pad = _round_up(D, 128)
    f_pad = _round_up(F, 128)

    if tm is None:
        tm = _choose_tm(M, d_pad, f_pad, jnp.dtype(cdt).itemsize)
    m_pad = _round_up(max(M, tm), tm)

    # Zero padding is exact: padded K rows of w1 are zero; gelu(0 + 0) = 0 feeds zero
    # rows of w2; padded output columns are sliced away below.
    x_p = _pad_cast_2d(x2, m_pad, d_pad, cdt)
    w1_p = _pad_cast_2d(w1.T, d_pad, f_pad, cdt)
    b1_p = _pad_cast_2d(b1.reshape(1, F), 1, f_pad, jnp.float32)
    w2_p = _pad_cast_2d(w2.T, f_pad, d_pad, cdt)
    b2_p = _pad_cast_2d(b2.reshape(1, D), 1, d_pad, jnp.float32)

    inputs = [x_p, w1_p, b1_p, w2_p, b2_p]
    in_specs = [
        pl.BlockSpec((tm, d_pad), lambda i: (i, 0)),
        pl.BlockSpec((d_pad, f_pad), lambda i: (0, 0)),
        pl.BlockSpec((1, f_pad), lambda i: (0, 0)),
        pl.BlockSpec((f_pad, d_pad), lambda i: (0, 0)),
        pl.BlockSpec((1, d_pad), lambda i: (0, 0)),
    ]
    if add_residual:
        res2 = (x if residual is None else residual).reshape(-1, D)
        inputs.append(_pad_cast_2d(res2, m_pad, d_pad, cdt))
        in_specs.append(pl.BlockSpec((tm, d_pad), lambda i: (i, 0)))

    stream_bytes = jnp.dtype(cdt).itemsize
    n_in_streams = 2 if add_residual else 1
    cost = pl.CostEstimate(
        flops=4 * m_pad * d_pad * f_pad,
        transcendentals=m_pad * f_pad,
        bytes_accessed=(n_in_streams * m_pad * d_pad * stream_bytes
                        + m_pad * d_pad * jnp.dtype(out_dtype).itemsize
                        + 2 * d_pad * f_pad * stream_bytes
                        + (d_pad + f_pad) * 4),
    )

    out_p = pl.pallas_call(
        functools.partial(_ffn_kernel, add_residual=add_residual),
        out_shape=jax.ShapeDtypeStruct((m_pad, d_pad), out_dtype),
        grid_spec=pltpu.PrefetchScalarGridSpec(
            num_scalar_prefetch=0,
            grid=(m_pad // tm,),
            in_specs=in_specs,
            out_specs=pl.BlockSpec((tm, d_pad), lambda i: (i, 0)),
        ),
        compiler_params=pltpu.CompilerParams(
            dimension_semantics=("parallel",),      # M tiles independent -> megacore on v7x
            vmem_limit_bytes=64 * 1024 * 1024,
        ),
        cost_estimate=cost,
        interpret=interpret,
    )(*inputs)

    return out_p[:M, :D].reshape(x.shape)


def ffn_reference(x, params, residual=None, add_residual=True):
    """Plain-JAX reference matching the PyTorch FFN forward (dropout=0)."""
    w1, b1, w2, b2 = params["w1"], params["b1"], params["w2"], params["b2"]
    h = x @ w1.T + b1
    h = 0.5 * h * (1.0 + jax.scipy.special.erf(h / jnp.sqrt(2.0)))   # exact GELU
    out = h @ w2.T + b2
    if not add_residual:
        return out
    res = x if residual is None else residual
    return res + out


def init_ffn_params(key, embed_dims, feedforward_channels, dtype=jnp.float32):
    """Matches FFN.init_weights(): xavier_normal_ on weights, normal(std=1e-6) biases."""
    k1, k2, k3, k4 = jax.random.split(key, 4)

    def xavier_normal(k, shape):          # torch Linear layout: (fan_out, fan_in)
        fan_out, fan_in = shape
        std = math.sqrt(2.0 / (fan_in + fan_out))
        return (jax.random.normal(k, shape, jnp.float32) * std).astype(dtype)

    return {
        "w1": xavier_normal(k1, (feedforward_channels, embed_dims)),
        "b1": (jax.random.normal(k2, (feedforward_channels,), jnp.float32) * 1e-6).astype(dtype),
        "w2": xavier_normal(k3, (embed_dims, feedforward_channels)),
        "b2": (jax.random.normal(k4, (embed_dims,), jnp.float32) * 1e-6).astype(dtype),
    }


if __name__ == "__main__":
    # Small, module-consistent shapes: batch=2, seq=8, embed_dims=32, ffn_channels=128.
    B, S, D, F = 2, 8, 32, 128

    key = jax.random.PRNGKey(0)
    kx, kp = jax.random.split(key)
    x = jax.random.normal(kx, (B, S, D), jnp.float32)
    params = init_ffn_params(kp, D, F)

    ref = ffn_reference(x, params)

    # f32 path — tight check.
    fwd_f32 = jax.jit(functools.partial(ffn_forward, add_residual=True))
    out = fwd_f32(x, params)
    jax.block_until_ready(out)
    assert out.shape == (B, S, D)
    assert jnp.allclose(out, ref, atol=1e-4, rtol=1e-4), float(jnp.max(jnp.abs(out - ref)))

    # bf16 compute path (perf feedback: halve HBM bytes, 2x MXU) — f32 output/accumulate,
    # looser tolerance for the bf16 input/weight quantization.
    fwd_bf16 = jax.jit(functools.partial(ffn_forward, add_residual=True,
                                         compute_dtype=jnp.bfloat16))
    out_bf16 = fwd_bf16(x, params)
    jax.block_until_ready(out_bf16)
    assert out_bf16.shape == (B, S, D)
    assert jnp.allclose(out_bf16, ref, atol=5e-2, rtol=5e-2), \
        float(jnp.max(jnp.abs(out_bf16 - ref)))

    print("KERNEL_OK")
</pallas_src>

<mosaic_0001>
module attributes {stable_mosaic.version = 11 : i64} {
  func.func @_ffn_kernel(%arg0: i32, %arg1: memref<16x128xf32, #tpu.memory_space<vmem>>, %arg2: memref<128x128xf32, #tpu.memory_space<vmem>>, %arg3: memref<1x128xf32, #tpu.memory_space<vmem>>, %arg4: memref<128x128xf32, #tpu.memory_space<vmem>>, %arg5: memref<1x128xf32, #tpu.memory_space<vmem>>, %arg6: memref<16x128xf32, #tpu.memory_space<vmem>>, %arg7: memref<16x128xf32, #tpu.memory_space<vmem>>) attributes {dimension_semantics = [#tpu.dimension_semantics<parallel>], iteration_bounds = array<i64: 1>, scalar_prefetch = 0 : i64, scratch_operands = 0 : i64, tpu.core_type = #tpu.core_type<tc>, window_params = [{transform_indices = @transform_0, window_bounds = array<i64: 16, 128>}, {pipeline_mode = #tpu.pipeline_mode<synchronous>, transform_indices = @transform_1, window_bounds = array<i64: 128, 128>}, {pipeline_mode = #tpu.pipeline_mode<synchronous>, transform_indices = @transform_2, window_bounds = array<i64: 1, 128>}, {pipeline_mode = #tpu.pipeline_mode<synchronous>, transform_indices = @transform_3, window_bounds = array<i64: 128, 128>}, {pipeline_mode = #tpu.pipeline_mode<synchronous>, transform_indices = @transform_4, window_bounds = array<i64: 1, 128>}, {transform_indices = @transform_5, window_bounds = array<i64: 16, 128>}, {transform_indices = @transform_6, window_bounds = array<i64: 16, 128>}]} {
    %c0 = arith.constant 0 : index
    %c0_0 = arith.constant 0 : index
    %0 = vector.load %arg1[%c0, %c0_0] : memref<16x128xf32, #tpu.memory_space<vmem>>, vector<16x128xf32>
    %c0_1 = arith.constant 0 : index
    %c0_2 = arith.constant 0 : index
    %1 = vector.load %arg2[%c0_1, %c0_2] : memref<128x128xf32, #tpu.memory_space<vmem>>, vector<128x128xf32>
    %cst = arith.constant dense<0.000000e+00> : vector<16x128xf32>
    %2 = tpu.matmul %0, %1, %cst {dimension_numbers = #tpu.dot_dimension_numbers<[1], [0], [0], [1], [0, 0, 1, 1], [], []>} : vector<16x128xf32>, vector<128x128xf32>, vector<16x128xf32> -> vector<16x128xf32>
    %c0_3 = arith.constant 0 : index
    %c0_4 = arith.constant 0 : index
    %3 = vector.load %arg3[%c0_3, %c0_4] : memref<1x128xf32, #tpu.memory_space<vmem>>, vector<1x128xf32>
    %4 = vector.broadcast %3 : vector<1x128xf32> to vector<16x128xf32>
    %5 = arith.addf %2, %4 : vector<16x128xf32>
    %cst_5 = arith.constant 5.000000e-01 : f32
    %6 = vector.broadcast %cst_5 : f32 to vector<16x128xf32>
    %7 = arith.mulf %6, %5 : vector<16x128xf32>
    %cst_6 = arith.constant 0.707106769 : f32
    %8 = vector.broadcast %cst_6 : f32 to vector<16x128xf32>
    %9 = arith.mulf %5, %8 : vector<16x128xf32>
    %cst_7 = arith.constant 0.000000e+00 : f32
    %10 = vector.broadcast %cst_7 : f32 to vector<16x128xf32>
    %11 = arith.cmpf olt, %9, %10 : vector<16x128xf32>
    %cst_8 = arith.constant -1.000000e+00 : f32
    %cst_9 = arith.constant 1.000000e+00 : f32
    %12 = vector.broadcast %cst_8 : f32 to vector<16x128xf32>
    %13 = vector.broadcast %cst_9 : f32 to vector<16x128xf32>
    %14 = arith.select %11, %12, %13 : vector<16x128xi1>, vector<16x128xf32>
    %15 = math.absf %9 : vector<16x128xf32>
    %cst_10 = arith.constant 0.327591091 : f32
    %16 = vector.broadcast %cst_10 : f32 to vector<16x128xf32>
    %17 = arith.mulf %16, %15 : vector<16x128xf32>
    %cst_11 = arith.constant 1.000000e+00 : f32
    %18 = vector.broadcast %cst_11 : f32 to vector<16x128xf32>
    %19 = arith.addf %18, %17 : vector<16x128xf32>
    %cst_12 = arith.constant 1.000000e+00 : f32
    %20 = vector.broadcast %cst_12 : f32 to vector<16x128xf32>
    %21 = arith.divf %20, %19 : vector<16x128xf32>
    %cst_13 = arith.constant 1.06140542 : f32
    %22 = vector.broadcast %cst_13 : f32 to vector<16x128xf32>
    %23 = arith.mulf %22, %21 : vector<16x128xf32>
    %cst_14 = arith.constant -1.45315206 : f32
    %24 = vector.broadcast %cst_14 : f32 to vector<16x128xf32>
    %25 = arith.addf %23, %24 : vector<16x128xf32>
    %26 = arith.mulf %25, %21 : vector<16x128xf32>
    %cst_15 = arith.constant 1.42141378 : f32
    %27 = vector.broadcast %cst_15 : f32 to vector<16x128xf32>
    %28 = arith.addf %26, %27 : vector<16x128xf32>
    %29 = arith.mulf %28, %21 : vector<16x128xf32>
    %cst_16 = arith.constant -0.284496725 : f32
    %30 = vector.broadcast %cst_16 : f32 to vector<16x128xf32>
    %31 = arith.addf %29, %30 : vector<16x128xf32>
    %32 = arith.mulf %31, %21 : vector<16x128xf32>
    %cst_17 = arith.constant 0.254829586 : f32
    %33 = vector.broadcast %cst_17 : f32 to vector<16x128xf32>
    %34 = arith.addf %32, %33 : vector<16x128xf32>
    %35 = arith.mulf %34, %21 : vector<16x128xf32>
    %cst_18 = arith.constant 0.000000e+00 : f32
    %36 = vector.broadcast %cst_18 : f32 to vector<16x128xf32>
    %37 = arith.subf %36, %15 : vector<16x128xf32>
    %38 = arith.mulf %37, %15 : vector<16x128xf32>
    %39 = math.exp %38 : vector<16x128xf32>
    %40 = arith.mulf %35, %39 : vector<16x128xf32>
    %cst_19 = arith.constant 1.000000e+00 : f32
    %41 = vector.broadcast %cst_19 : f32 to vector<16x128xf32>
    %42 = arith.subf %41, %40 : vector<16x128xf32>
    %43 = arith.mulf %14, %42 : vector<16x128xf32>
    %cst_20 = arith.constant 1.000000e+00 : f32
    %44 = vector.broadcast %cst_20 : f32 to vector<16x128xf32>
    %45 = arith.addf %44, %43 : vector<16x128xf32>
    %46 = arith.mulf %7, %45 : vector<16x128xf32>
    %c0_21 = arith.constant 0 : index
    %c0_22 = arith.constant 0 : index
    %47 = vector.load %arg4[%c0_21, %c0_22] : memref<128x128xf32, #tpu.memory_space<vmem>>, vector<128x128xf32>
    %cst_23 = arith.constant dense<0.000000e+00> : vector<16x128xf32>
    %48 = tpu.matmul %46, %47, %cst_23 {dimension_numbers = #tpu.dot_dimension_numbers<[1], [0], [0], [1], [0, 0, 1, 1], [], []>} : vector<16x128xf32>, vector<128x128xf32>, vector<16x128xf32> -> vector<16x128xf32>
    %c0_24 = arith.constant 0 : index
    %c0_25 = arith.constant 0 : index
    %49 = vector.load %arg5[%c0_24, %c0_25] : memref<1x128xf32, #tpu.memory_space<vmem>>, vector<1x128xf32>
    %50 = vector.broadcast %49 : vector<1x128xf32> to vector<16x128xf32>
    %51 = arith.addf %48, %50 : vector<16x128xf32>
    %c0_26 = arith.constant 0 : index
    %c0_27 = arith.constant 0 : index
    %52 = vector.load %arg6[%c0_26, %c0_27] : memref<16x128xf32, #tpu.memory_space<vmem>>, vector<16x128xf32>
    %53 = arith.addf %51, %52 : vector<16x128xf32>
    %c0_28 = arith.constant 0 : index
    %c0_29 = arith.constant 0 : index
    %54 = vector.load %arg7[%c0_28, %c0_29] : memref<16x128xf32, #tpu.memory_space<vmem>>, vector<16x128xf32>
    tpu.vector_store %arg7[%c0_28, %c0_29], %53 {strides = array<i32>} : memref<16x128xf32, #tpu.memory_space<vmem>>, vector<16x128xf32>,
    return
  }
  func.func @transform_0(%arg0: i32) -> (i32, i32) {
    %c0_i32 = arith.constant 0 : i32
    %c0_i32_0 = arith.constant 0 : i32
    return %arg0, %c0_i32 : i32, i32
  }
  func.func @transform_1(%arg0: i32) -> (i32, i32) {
    %c0_i32 = arith.constant 0 : i32
    %c0_i32_0 = arith.constant 0 : i32
    %c0_i32_1 = arith.constant 0 : i32
    return %c0_i32, %c0_i32_0 : i32, i32
  }
  func.func @transform_2(%arg0: i32) -> (i32, i32) {
    %c0_i32 = arith.constant 0 : i32
    %c0_i32_0 = arith.constant 0 : i32
    %c0_i32_1 = arith.constant 0 : i32
    return %c0_i32, %c0_i32_0 : i32, i32
  }
  func.func @transform_3(%arg0: i32) -> (i32, i32) {
    %c0_i32 = arith.constant 0 : i32
    %c0_i32_0 = arith.constant 0 : i32
    %c0_i32_1 = arith.constant 0 : i32
    return %c0_i32, %c0_i32_0 : i32, i32
  }
  func.func @transform_4(%arg0: i32) -> (i32, i32) {
    %c0_i32 = arith.constant 0 : i32
    %c0_i32_0 = arith.constant 0 : i32
    %c0_i32_1 = arith.constant 0 : i32
    return %c0_i32, %c0_i32_0 : i32, i32
  }
  func.func @transform_5(%arg0: i32) -> (i32, i32) {
    %c0_i32 = arith.constant 0 : i32
    %c0_i32_0 = arith.constant 0 : i32
    return %arg0, %c0_i32 : i32, i32
  }
  func.func @transform_6(%arg0: i32) -> (i32, i32) {
    %c0_i32 = arith.constant 0 : i32
    %c0_i32_0 = arith.constant 0 : i32
    return %arg0, %c0_i32 : i32, i32
  }
}

</mosaic_0001>

<bundles_post_ra>
// kernel: ffn_forward.1
= control target key start
LH: loop header
LB: loop body
LE: loop exit
PB: predicated region body
PF: predicated region fallthrough
CT: control target
= control target key end

     0   :  { %s558_s1 = inlined_call_operand.vmem [shape: f32[128,128], index: 1, kind: input, shape index: {}]   ;;  %s559_s0 = inlined_call_operand.vmem [shape: f32[16,128], index: 0, kind: input, shape index: {}, may-alias: {0,5}]   ;;  %s560_s3 = inlined_call_operand.vmem [shape: f32[128,128], index: 3, kind: input, shape index: {}]   ;;  %s561_s2 = inlined_call_operand.vmem [shape: f32[1,128], index: 2, kind: input, shape index: {}]   ;;  %s562_s4 = inlined_call_operand.vmem [shape: f32[1,128], index: 4, kind: input, shape index: {}]   ;;  %s563_s5 = inlined_call_operand.vmem [shape: f32[16,128], index: 5, kind: input, shape index: {}, may-alias: {0,5}]   ;;  %s564_s6 = inlined_call_operand.vmem [shape: f32[16,128], index: 6, kind: output, shape index: {}]  }
   0x1   :  { %v40_v0 = vld [vmem:[%s558_s1 + $0x78] sm:$0xff]  ;;  %v39_v1 = vld [vmem:[%s558_s1 + $0x70] sm:$0xff]  ;;  %v38_v2 = vld [vmem:[%s558_s1 + $0x68] sm:$0xff] }
   0x2   :  { %323 = vmatprep.subr.mxu0 %v40_v0  ;;  %v37_v3 = vld [vmem:[%s558_s1 + $0x60] sm:$0xff]  ;;  %v36_v5 = vld [vmem:[%s558_s1 + $0x58] sm:$0xff]  ;;  %v35_v6 = vld [vmem:[%s558_s1 + $0x50] sm:$0xff] }
   0x3   :  { %324 = vmatpush3.msra.mxu0 %v40_v0  ;;  %v23_v4 = vld [vmem:[%s559_s0] sm:$0xff]  ;;  %v34_v7 = vld [vmem:[%s558_s1 + $0x48] sm:$0xff]  ;;  %v32_v9 = vld [vmem:[%s558_s1 + $0x38] sm:$0xff] }
   0x4   :  { %325 = vmatprep.subr.mxu0 %v39_v1  ;;  %355 = vmatprep.mubr.f32.mxu0 %v23_v4  ;;  %v33_v8 = vld [vmem:[%s558_s1 + $0x40] sm:$0xff]  ;;  %v31_v10 = vld [vmem:[%s558_s1 + $0x30] sm:$0xff]  ;;  %v30_v11 = vld [vmem:[%s558_s1 + $0x28] sm:$0xff] }
   0x5   :  { %326 = vmatpush3.msra.mxu0 %v39_v1  ;;  %v29_v12 = vld [vmem:[%s558_s1 + $0x20] sm:$0xff]  ;;  %v28_v13 = vld [vmem:[%s558_s1 + $0x18] sm:$0xff]  ;;  %v27_v14 = vld [vmem:[%s558_s1 + $0x10] sm:$0xff] }
   0x6   :  { %327 = vmatprep.subr.mxu0 %v38_v2  ;;  %v26_v15 = vld [vmem:[%s558_s1 + $0x8] sm:$0xff]  ;;  %v25_v16 = vld [vmem:[%s558_s1] sm:$0xff]  ;;  %v192_v18 = vld [vmem:[%s560_s3 + $0x78] sm:$0xff] }
   0x7   :  { %328 = vmatpush3.msra.mxu0 %v38_v2  ;;  %v24_v17 = vld [vmem:[%s559_s0 + $0x8] sm:$0xff]  ;;  %v191_v19 = vld [vmem:[%s560_s3 + $0x70] sm:$0xff]  ;;  %358 = vmatprep.subr.mxu1 %v192_v18  ;;  %v189_v21 = vld [vmem:[%s560_s3 + $0x60] sm:$0xff] }
   0x8   :  { %329 = vmatprep.subr.mxu0 %v37_v3  ;;  %359 = vmatpush3.msra.mxu1 %v192_v18  ;;  %v190_v20 = vld [vmem:[%s560_s3 + $0x68] sm:$0xff]  ;;  %v188_v22 = vld [vmem:[%s560_s3 + $0x58] sm:$0xff]  ;;  %v187_v23 = vld [vmem:[%s560_s3 + $0x50] sm:$0xff] }
   0x9   :  { %330 = vmatpush3.msra.mxu0 %v37_v3  ;;  %360 = vmatprep.subr.mxu1 %v191_v19  ;;  %v186_v24 = vld [vmem:[%s560_s3 + $0x48] sm:$0xff]  ;;  %v185_v25 = vld [vmem:[%s560_s3 + $0x40] sm:$0xff]  ;;  %v184_v26 = vld [vmem:[%s560_s3 + $0x38] sm:$0xff] }
   0xa   :  { %331 = vmatprep.subr.mxu0 %v36_v5  ;;  %361 = vmatpush3.msra.mxu1 %v191_v19  ;;  %v183_v27 = vld [vmem:[%s560_s3 + $0x30] sm:$0xff]  ;;  %v182_v28 = vld [vmem:[%s560_s3 + $0x28] sm:$0xff]  ;;  %v181_v29 = vld [vmem:[%s560_s3 + $0x20] sm:$0xff] }
   0xb   :  { %332 = vmatpush3.msra.mxu0 %v36_v5  ;;  %362 = vmatprep.subr.mxu1 %v190_v20  ;;  %v180_v30 = vld [vmem:[%s560_s3 + $0x18] sm:$0xff]  ;;  %v179_v31 = vld [vmem:[%s560_s3 + $0x10] sm:$0xff]  ;;  %v178_v32 = vld [vmem:[%s560_s3 + $0x8] sm:$0xff] }
   0xc   :  { %333 = vmatprep.subr.mxu0 %v35_v6  ;;  %363 = vmatpush3.msra.mxu1 %v190_v20  ;;  %v177_v33 = vld [vmem:[%s560_s3] sm:$0xff] }
   0xd   :  { %334 = vmatpush3.msra.mxu0 %v35_v6  ;;  %364 = vmatprep.subr.mxu1 %v189_v21  ;;  %v285_v34 = vld [vmem:[%s561_s2] ss:$0 sm:$0xff] }
   0xe   :  { %335 = vmatprep.subr.mxu0 %v34_v7  ;;  %365 = vmatpush3.msra.mxu1 %v189_v21 }
   0xf   :  { %336 = vmatpush3.msra.mxu0 %v34_v7  ;;  %366 = vmatprep.subr.mxu1 %v188_v22 }
  0x10   :  { %337 = vmatprep.subr.mxu0 %v33_v8  ;;  %367 = vmatpush3.msra.mxu1 %v188_v22 }
  0x11   :  { %338 = vmatpush3.msra.mxu0 %v33_v8  ;;  %368 = vmatprep.subr.mxu1 %v187_v23 }
  0x12   :  { %339 = vmatprep.subr.mxu0 %v32_v9  ;;  %369 = vmatpush3.msra.mxu1 %v187_v23 }
  0x13   :  { %340 = vmatpush3.msra.mxu0 %v32_v9  ;;  %370 = vmatprep.subr.mxu1 %v186_v24 }
  0x14   :  { %341 = vmatprep.subr.mxu0 %v31_v10  ;;  %371 = vmatpush3.msra.mxu1 %v186_v24 }
  0x15   :  { %342 = vmatpush3.msra.mxu0 %v31_v10  ;;  %372 = vmatprep.subr.mxu1 %v185_v25 }
  0x16   :  { %343 = vmatprep.subr.mxu0 %v30_v11  ;;  %373 = vmatpush3.msra.mxu1 %v185_v25 }
  0x17   :  { %344 = vmatpush3.msra.mxu0 %v30_v11  ;;  %374 = vmatprep.subr.mxu1 %v184_v26 }
  0x18   :  { %345 = vmatprep.subr.mxu0 %v29_v12  ;;  %375 = vmatpush3.msra.mxu1 %v184_v26  ;;  %v286_v26 = vld [vmem:[%s562_s4] ss:$0 sm:$0xff] }
  0x19   :  { %346 = vmatpush3.msra.mxu0 %v29_v12  ;;  %376 = vmatprep.subr.mxu1 %v183_v27 }
  0x1a   :  { %347 = vmatprep.subr.mxu0 %v28_v13  ;;  %377 = vmatpush3.msra.mxu1 %v183_v27 }
  0x1b   :  { %348 = vmatpush3.msra.mxu0 %v28_v13  ;;  %378 = vmatprep.subr.mxu1 %v182_v28  ;;  %v402_v13 = vmov 1.0  }
  0x1c   :  { %349 = vmatprep.subr.mxu0 %v27_v14  ;;  %379 = vmatpush3.msra.mxu1 %v182_v28  ;;  %v276_v28 = vld [vmem:[%s563_s5 + $0x8] sm:$0xff] }
  0x1d   :  { %350 = vmatpush3.msra.mxu0 %v27_v14  ;;  %380 = vmatprep.subr.mxu1 %v181_v29 }
  0x1e   :  { %351 = vmatprep.subr.mxu0 %v26_v15  ;;  %381 = vmatpush3.msra.mxu1 %v181_v29 }
  0x1f   :  { %352 = vmatpush3.msra.mxu0 %v26_v15  ;;  %382 = vmatprep.subr.mxu1 %v180_v30 }
  0x20   :  { %353 = vmatprep.subr.mxu0 %v25_v16  ;;  %383 = vmatpush3.msra.mxu1 %v180_v30 }
  0x21   :  { %354 = vmatpush3.msra.mxu0 %v25_v16  ;;  %384 = vmatprep.subr.mxu1 %v179_v31 }
  0x22   :  { %356 = vmatmul.mubr.f32.vlgmr.msra.gmra.mxu0 %v24_v17  ;;  %385 = vmatpush3.msra.mxu1 %v179_v31  ;;  %v275_v31 = vld [vmem:[%s563_s5] sm:$0xff] }
  0x23   :  { %386 = vmatprep.subr.mxu1 %v178_v32 }
  0x24   :  { %387 = vmatpush3.msra.mxu1 %v178_v32 }
  0x25   :  { %388 = vmatprep.subr.mxu1 %v177_v33 }
  0x26   :  { %389 = vmatpush3.msra.mxu1 %v177_v33 }
  0xe2   :  { %v357_v35 = vpop.f32.mrf.mxu0 }
  0xe3   :  { %v120_v36 = vadd.f32 %v357_v35, %v285_v34 }
  0xe4   :  { %v114_v37 = vpop.f32.mrf.mxu0 }
  0xe5   :  { %v126_v38 = vmul.f32 0.70710677, %v120_v36  ;;  %v115_v39 = vadd.f32 %v285_v34, %v114_v37  ;;  %v124_v23 = vmul.f32 0.5, %v120_v36 }
  0xe7   :  { %v132_v40 = vand.u32 2147483647, %v126_v38  ;;  %v125_v41 = vmul.f32 0.70710677, %v115_v39  ;;  %vm128_vm0 = vcmp.lt.f32.partialorder %v126_v38, 0.0  ;;  %v123_v21 = vmul.f32 0.5, %v115_v39 }
  0xe8   :  { %v130_v14 = vsel %vm128_vm0, -1.0, %v402_v13 }
  0xe9   :  { %v134_v42 = vmul.f32 0.3275911, %v132_v40  ;;  %v131_v43 = vand.u32 2147483647, %v125_v41  ;;  %v160_v47 = vsub.f32 0.0, %v132_v40  ;;  %vm127_vm1 = vcmp.lt.f32.partialorder %v125_v41, 0.0 }
  0xea   :  { %v129_v18 = vsel %vm127_vm1, -1.0, %v402_v13 }
  0xeb   :  { %v136_v44 = vadd.f32 1.0, %v134_v42  ;;  %v133_v45 = vmul.f32 0.3275911, %v131_v43  ;;  %v159_v48 = vsub.f32 0.0, %v131_v43  ;;  %v162_v49 = vmul.f32 %v160_v47, %v132_v40 }
  0xed   :  { %394 = vrcp.f32 %v136_v44  ;;  %v135_v46 = vadd.f32 1.0, %v133_v45  ;;  %v161_v51 = vmul.f32 %v159_v48, %v131_v43  ;;  %v165_v52 = vmul.f32 1.442695, %v162_v49 }
  0xef   :  { %396 = vrcp.f32 %v135_v46  ;;  %v163_v56 = vmul.f32 1.442695, %v161_v51 }
  0xf0   :  { %398 = vpow2.f32 %v165_v52 }
  0xf1   :  { %400 = vpow2.f32 %v163_v56 }
  0xfa   :  { %v395_v50 = vpop.eup %394 }
  0xfb   :  { %v142_v53 = vmul.f32 1.0614054, %v395_v50 }
  0xfc   :  { %v397_v54 = vpop.eup %396 }
  0xfd   :  { %v144_v55 = vadd.f32 -1.4531521, %v142_v53  ;;  %v141_v57 = vmul.f32 1.0614054, %v397_v54  ;;  %v399_v7 = vpop.eup %398 }
  0xfe   :  { %v401_v11 = vpop.eup %400 }
  0xff   :  { %v146_v58 = vmul.f32 %v395_v50, %v144_v55  ;;  %v143_v59 = vadd.f32 -1.4531521, %v141_v57 }
 0x101   :  { %v148_v60 = vadd.f32 1.4214138, %v146_v58  ;;  %v145_v61 = vmul.f32 %v397_v54, %v143_v59 }
 0x103   :  { %v150_v62 = vmul.f32 %v395_v50, %v148_v60  ;;  %v147_v63 = vadd.f32 1.4214138, %v145_v61 }
 0x105   :  { %v152_v0 = vadd.f32 -0.28449672, %v150_v62  ;;  %v149_v1 = vmul.f32 %v397_v54, %v147_v63 }
 0x107   :  { %v154_v2 = vmul.f32 %v395_v50, %v152_v0  ;;  %v151_v3 = vadd.f32 -0.28449672, %v149_v1 }
 0x109   :  { %v156_v4 = vadd.f32 0.2548296, %v154_v2  ;;  %v153_v5 = vmul.f32 %v397_v54, %v151_v3 }
 0x10b   :  { %v158_v6 = vmul.f32 %v395_v50, %v156_v4  ;;  %v155_v8 = vadd.f32 0.2548296, %v153_v5 }
 0x10d   :  { %v168_v9 = vmul.f32 %v399_v7, %v158_v6  ;;  %v157_v10 = vmul.f32 %v397_v54, %v155_v8 }
 0x10f   :  { %v170_v12 = vsub.f32 1.0, %v168_v9  ;;  %v167_v15 = vmul.f32 %v401_v11, %v157_v10 }
 0x111   :  { %v172_v16 = vmul.f32 %v170_v12, %v130_v14  ;;  %v169_v17 = vsub.f32 1.0, %v167_v15 }
 0x113   :  { %v171_v19 = vmul.f32 %v169_v17, %v129_v18  ;;  %v174_v20 = vadd.f32 1.0, %v172_v16 }
 0x115   :  { %v173_v22 = vadd.f32 1.0, %v171_v19  ;;  %v176_v25 = vmul.f32 %v174_v20, %v124_v23 }
 0x117   :  { %v175_v24 = vmul.f32 %v173_v22, %v123_v21 }
 0x119   :  { %390 = vmatprep.mubr.f32.mxu1 %v175_v24 }
 0x11a   :  { %391 = vmatmul.mubr.f32.vlgmr.msra.gmra.mxu1 %v176_v25 }
 0x1da   :  { %v392_v27 = vpop.f32.mrf.mxu1 }
 0x1db   :  { %v272_v29 = vadd.f32 %v392_v27, %v286_v26 }
 0x1dc   :  { %v266_v30 = vpop.f32.mrf.mxu1 }
 0x1dd   :  { %v278_v32 = vadd.f32 %v276_v28, %v272_v29  ;;  %v267_v33 = vadd.f32 %v286_v26, %v266_v30 }
 0x1df   :  { %280 = vst [vmem:[%s564_s6 + $0x8] sm:$0xff] %v278_v32  ;;  %v277_v34 = vadd.f32 %v275_v31, %v267_v33 }
 0x1e1   :  { %279 = vst [vmem:[%s564_s6] sm:$0xff] %v277_v34 }

</bundles_post_ra>
